<compile_context>
chip_gen: v7x
topology: tpu7x:2x2x1
jax: 0.10.0
libtpu: 0.0.40
codegen_flags: <defaults>
</compile_context>

<pallas_src>
import math

import jax
import jax.numpy as jnp
from jax.experimental import pallas as pl
from jax.experimental.pallas import tpu as pltpu


def _affine_kernel(x_ref, w_ref, b_ref, o_ref):
    # One MXU matmul per batch tile: (TB, D_in) bf16 @ (D_in, 3) bf16 -> f32.
    acc = jnp.dot(x_ref[...], w_ref[...], preferred_element_type=jnp.float32)
    o_ref[...] = (acc + b_ref[...]).astype(o_ref.dtype)


def _round_up(n, m):
    return ((n + m - 1) // m) * m


def _torch_linear_init(key, fan_in, fan_out):
    """Deterministic analogue of torch.nn.Linear default init (uniform +/- 1/sqrt(fan_in))."""
    kw, kb = jax.random.split(key)
    bound = 1.0 / math.sqrt(fan_in)
    # Stored transposed: (fan_in, fan_out) so matmuls are plain x @ W.
    w = jax.random.uniform(kw, (fan_in, fan_out), jnp.float32, -bound, bound)
    b = jax.random.uniform(kb, (1, fan_out), jnp.float32, -bound, bound)
    return w, b


def make_regression_head_params(key, input_dim, output_dim=3):
    k0, k1, k2, k3 = jax.random.split(key, 4)
    w0, b0 = _torch_linear_init(k0, input_dim, 512)   # the Linear built in forward()
    w1, b1 = _torch_linear_init(k1, 512, 128)
    w2, b2 = _torch_linear_init(k2, 128, 32)
    w3, b3 = _torch_linear_init(k3, 32, output_dim)
    return (w0, b0, w1, b1, w2, b2, w3, b3)


def fold_params(params):
    """Collapse the linear stack (no activations, eval-mode dropout = identity)."""
    w0, b0, w1, b1, w2, b2, w3, b3 = params
    hp = jax.lax.Precision.HIGHEST  # tiny one-off folding matmuls: keep them exact
    w_eff = jnp.dot(jnp.dot(jnp.dot(w0, w1, precision=hp), w2, precision=hp),
                    w3, precision=hp)                               # (D_in, out)
    b_eff = jnp.dot(jnp.dot(jnp.dot(b0, w1, precision=hp) + b1, w2, precision=hp) + b2,
                    w3, precision=hp) + b3                          # (1, out)
    return w_eff, b_eff


def regression_head_forward(x, params, *, block_rows=1024):
    """y = RegressionHead(x) for x of shape (B, D_in), returns (B, output_dim) f32."""
    w_eff_f32, b_eff = fold_params(params)
    B, D_in = x.shape
    out_dim = w_eff_f32.shape[1]

    # bf16 operands (native MXU path, half the HBM traffic); bias add stays f32.
    x_bf = x.astype(jnp.bfloat16)
    w_bf = w_eff_f32.astype(jnp.bfloat16)

    # Batch tile: multiple of 16 (bf16 sublane packing), capped at `block_rows`
    # so double-buffered tiles fit the scoped-VMEM budget on every generation.
    tb = min(block_rows, _round_up(B, 16))
    b_pad = _round_up(B, tb)
    if b_pad != B:
        x_bf = jnp.pad(x_bf, ((0, b_pad - B), (0, 0)))

    out = pl.pallas_call(
        _affine_kernel,
        out_shape=jax.ShapeDtypeStruct((b_pad, out_dim), jnp.float32),
        grid=(b_pad // tb,),
        in_specs=[
            pl.BlockSpec((tb, D_in), lambda i: (i, 0)),        # streamed batch tile
            pl.BlockSpec((D_in, out_dim), lambda i: (0, 0)),   # resident weights
            pl.BlockSpec((1, out_dim), lambda i: (0, 0)),      # resident bias
        ],
        out_specs=pl.BlockSpec((tb, out_dim), lambda i: (i, 0)),
        compiler_params=pltpu.CompilerParams(
            dimension_semantics=("parallel",)),                # v7x: 2 TCs share batch
    )(x_bf, w_bf, b_eff)

    # x.view(x.size(0), -1) on a 2-D result is a no-op; just drop batch padding.
    return out[:B]


def _reference_layered_f32(x, params):
    w0, b0, w1, b1, w2, b2, w3, b3 = params
    h = x @ w0 + b0
    h = h @ w1 + b1
    h = h @ w2 + b2
    h = h @ w3 + b3
    return h


def _reference_collapsed_bf16(x, params):
    """Same arithmetic pattern as the kernel (bf16 operands, f32 accumulation)."""
    w_eff, b_eff = fold_params(params)
    xb = x.astype(jnp.bfloat16).astype(jnp.float32)
    wb = w_eff.astype(jnp.bfloat16).astype(jnp.float32)
    return xb @ wb + b_eff


if __name__ == "__main__":
    key = jax.random.PRNGKey(0)
    kx, kp = jax.random.split(key)

    B, D_in = 8, 32  # small synthetic shapes; forward infers input dim from x
    x = jax.random.normal(kx, (B, D_in), jnp.float32)

    params = make_regression_head_params(kp, input_dim=D_in, output_dim=3)

    out = regression_head_forward(x, params)
    out = jax.block_until_ready(out)
    assert out.shape == (B, 3), out.shape

    # Tight check against a reference doing exactly what the kernel does.
    ref_exact = _reference_collapsed_bf16(x, params)
    assert jnp.allclose(out, ref_exact, atol=1e-4, rtol=1e-4), "mismatch vs bf16 reference"

    # Loose sanity check against the full-precision layered forward
    # (differences are bf16 input quantization only).
    ref_f32 = _reference_layered_f32(x, params)
    assert jnp.allclose(out, ref_f32, atol=2e-2, rtol=2e-2), "mismatch vs f32 layered reference"

    print("KERNEL_OK")
</pallas_src>

<mosaic_0001>
module attributes {stable_mosaic.version = 11 : i64} {
  func.func @_affine_kernel(%arg0: i32, %arg1: memref<16x32xbf16, #tpu.memory_space<vmem>>, %arg2: memref<32x3xbf16, #tpu.memory_space<vmem>>, %arg3: memref<1x3xf32, #tpu.memory_space<vmem>>, %arg4: memref<16x3xf32, #tpu.memory_space<vmem>>) attributes {dimension_semantics = [#tpu.dimension_semantics<parallel>], iteration_bounds = array<i64: 1>, scalar_prefetch = 0 : i64, scratch_operands = 0 : i64, tpu.core_type = #tpu.core_type<tc>, window_params = [{transform_indices = @transform_0, window_bounds = array<i64: 16, 32>}, {pipeline_mode = #tpu.pipeline_mode<synchronous>, transform_indices = @transform_1, window_bounds = array<i64: 32, 3>}, {pipeline_mode = #tpu.pipeline_mode<synchronous>, transform_indices = @transform_2, window_bounds = array<i64: 1, 3>}, {transform_indices = @transform_3, window_bounds = array<i64: 16, 3>}]} {
    %c0 = arith.constant 0 : index
    %c0_0 = arith.constant 0 : index
    %0 = vector.load %arg1[%c0, %c0_0] : memref<16x32xbf16, #tpu.memory_space<vmem>>, vector<16x32xbf16>
    %c0_1 = arith.constant 0 : index
    %c0_2 = arith.constant 0 : index
    %1 = vector.load %arg2[%c0_1, %c0_2] : memref<32x3xbf16, #tpu.memory_space<vmem>>, vector<32x3xbf16>
    %cst = arith.constant dense<0.000000e+00> : vector<16x3xf32>
    %2 = tpu.matmul %0, %1, %cst {dimension_numbers = #tpu.dot_dimension_numbers<[1], [0], [0], [1], [0, 0, 1, 1], [], []>} : vector<16x32xbf16>, vector<32x3xbf16>, vector<16x3xf32> -> vector<16x3xf32>
    %c0_3 = arith.constant 0 : index
    %c0_4 = arith.constant 0 : index
    %3 = vector.load %arg3[%c0_3, %c0_4] : memref<1x3xf32, #tpu.memory_space<vmem>>, vector<1x3xf32>
    %4 = vector.broadcast %3 : vector<1x3xf32> to vector<16x3xf32>
    %5 = arith.addf %2, %4 : vector<16x3xf32>
    %c0_5 = arith.constant 0 : index
    %c0_6 = arith.constant 0 : index
    %6 = vector.load %arg4[%c0_5, %c0_6] : memref<16x3xf32, #tpu.memory_space<vmem>>, vector<16x3xf32>
    tpu.vector_store %arg4[%c0_5, %c0_6], %5 {strides = array<i32>} : memref<16x3xf32, #tpu.memory_space<vmem>>, vector<16x3xf32>,
    return
  }
  func.func @transform_0(%arg0: i32) -> (i32, i32) {
    %c0_i32 = arith.constant 0 : i32
    %c0_i32_0 = arith.constant 0 : i32
    return %arg0, %c0_i32 : i32, i32
  }
  func.func @transform_1(%arg0: i32) -> (i32, i32) {
    %c0_i32 = arith.constant 0 : i32
    %c0_i32_0 = arith.constant 0 : i32
    %c0_i32_1 = arith.constant 0 : i32
    return %c0_i32, %c0_i32_0 : i32, i32
  }
  func.func @transform_2(%arg0: i32) -> (i32, i32) {
    %c0_i32 = arith.constant 0 : i32
    %c0_i32_0 = arith.constant 0 : i32
    %c0_i32_1 = arith.constant 0 : i32
    return %c0_i32, %c0_i32_0 : i32, i32
  }
  func.func @transform_3(%arg0: i32) -> (i32, i32) {
    %c0_i32 = arith.constant 0 : i32
    %c0_i32_0 = arith.constant 0 : i32
    return %arg0, %c0_i32 : i32, i32
  }
}

</mosaic_0001>

<bundles_post_ra>
// kernel: tpu_custom_call.1
= control target key start
LH: loop header
LB: loop body
LE: loop exit
PB: predicated region body
PF: predicated region fallthrough
CT: control target
= control target key end

     0   :  { %v118_v0 = vmov 0.0   ;;  %vm119_vm0 = vmmov 0   ;;  %vm45_vm1 = vcmask 261120   ;;  %vm90_vm2 = vcmask 23552   ;;  %s158_s1 = inlined_call_operand.vmem [shape: bf16[32,3], index: 1, kind: input, shape index: {}]   ;;  %s159_s0 = inlined_call_operand.vmem [shape: bf16[16,32], index: 0, kind: input, shape index: {}]   ;;  %s160_s2 = inlined_call_operand.vmem [shape: f32[1,3], index: 2, kind: input, shape index: {}]   ;;  %s161_s3 = inlined_call_operand.vmem [shape: f32[16,3], index: 3, kind: output, shape index: {}]  }
   0x1   :  { %105 = vmatprep.subr.bf16.mxu0 %v118_v0  ;;  %v115_v1 = vld [vmem:[%s158_s1] sm:$0xff]   ;;  %109 = vmatprep.mubr.msk.bf16.mxu0 %vm119_vm0, %v118_v0  ;;  %v116_v2 = vld [vmem:[%s158_s1 + $0x8] sm:$0xff]  }
   0x2   :  { %106 = vmatpush3.bf16.msra.mxu0 %v115_v1  ;;  %v117_v3 = vld [vmem:[%s159_s0] sm:$0xff]  }
   0x3   :  { %107 = vmatprep.subr.bf16.mxu0 %v118_v0  ;;  %v97_v4 = vld [vmem:[%s160_s2] ss:$0 sm:$0xff] }
   0x6   :  { %108 = vmatpush3.bf16.msra.mxu0 %v116_v2 }
   0x9   :  { %110 = vmatmul.mubr.msk.bf16.vlgmr.msra.gmra.mrb[0].mxu0 %vm45_vm1, %v117_v3 }
  0xdc   :  { %v83_v5 = vpop.f32.mrb[0].mxu0 }
  0xdd   :  { %v84_v6 = vadd.f32 %v97_v4, %v83_v5  ;;  %v111_v7 = vpop.f32.mrb[1].mxu0 }
  0xde   :  { %v86_v8 = vpop.f32.mrb[2].mxu0 }
  0xdf   :  { %91 = vst.msk [vmem:[%s161_s3] sm:$0xff] %vm90_vm2, %v84_v6  ;;  %v87_v9 = vadd.f32 %v97_v4, %v86_v8  ;;  %v112_v10 = vpop.f32.mrb[3].mxu0 }
  0xe1   :  { %92 = vst.msk [vmem:[%s161_s3 + $0x8] sm:$0xff] %vm90_vm2, %v87_v9 }

</bundles_post_ra>
